<compile_context>
chip_gen: v7x
topology: tpu7x:2x2x1
jax: 0.10.0
libtpu: 0.0.40
codegen_flags: <defaults>
</compile_context>

<pallas_src>
import functools

import jax
import jax.numpy as jnp
from jax.experimental import pallas as pl
from jax.experimental.pallas import tpu as pltpu

_VMEM_LIMIT = 32 * 1024 * 1024   # safe on v5e/v6e (128 MiB) and within v7x's 64 MiB physical
_BN_EPS = 1e-5


def _round_up(x, m):
    return (x + m - 1) // m * m


# --------------------------------------------------------------------------
# Pallas kernels
# --------------------------------------------------------------------------

def _act_matmul_t_kernel(w_ref, a_ref, o_ref, *, act):
    """o = w @ act(a)  (transposed, lane-dense formulation).

    w: (Cout, K) bf16 resident weight; a: (K, tn) bf16 im2col tile (output pixels on lanes);
    o: (Cout, tn). The activation commutes with the zero padding baked into the im2col
    matrix and with the lane zero-padding (act(0) == 0)."""
    a = a_ref[...].astype(jnp.float32)          # act in f32 (portable to v5e's non-bf16 VPU)
    if act == "leaky_relu":
        a = jnp.where(a >= 0.0, a, 0.2 * a)
    elif act == "relu":
        a = jnp.maximum(a, 0.0)
    a = a.astype(jnp.bfloat16)                  # bf16 MXU operands, f32 accumulate
    o_ref[...] = jnp.dot(w_ref[...], a,
                         preferred_element_type=jnp.float32).astype(o_ref.dtype)


def act_matmul_t(w_t, a_t, *, act, out_dtype, tn):
    """Grid over the pixel (lane) axis; the small weight stays resident in VMEM."""
    c, k = w_t.shape
    k2, m = a_t.shape
    assert k == k2 and m % tn == 0
    return pl.pallas_call(
        functools.partial(_act_matmul_t_kernel, act=act),
        out_shape=jax.ShapeDtypeStruct((c, m), out_dtype),
        grid=(m // tn,),
        in_specs=[
            pl.BlockSpec((c, k), lambda i: (0, 0)),      # resident weight
            pl.BlockSpec((k, tn), lambda i: (0, i)),     # streamed im2col tile
        ],
        out_specs=pl.BlockSpec((c, tn), lambda i: (0, i)),   # lane-dense output
        compiler_params=pltpu.CompilerParams(
            dimension_semantics=("parallel",),
            vmem_limit_bytes=_VMEM_LIMIT),
    )(w_t, a_t)


def _bn_stats_kernel(u_ref, sum_ref, ssq_ref):
    """Per-channel sum / sum-of-squares accumulated over the batch grid axis.
    Outputs have a constant block index -> VMEM-resident accumulators, one HBM write."""
    @pl.when(pl.program_id(0) == 0)
    def _init():
        sum_ref[...] = jnp.zeros_like(sum_ref)
        ssq_ref[...] = jnp.zeros_like(ssq_ref)

    u = u_ref[0]                                         # (Cout, HW), lane-dense
    sum_ref[...] += jnp.sum(u, axis=-1, keepdims=True)
    ssq_ref[...] += jnp.sum(u * u, axis=-1, keepdims=True)


def bn_stats(u_flat):
    """u_flat: (N, Cout, HW) f32 -> (sum, sumsq), each (Cout, 1) f32."""
    N, Cout, HW = u_flat.shape
    return pl.pallas_call(
        _bn_stats_kernel,
        out_shape=(jax.ShapeDtypeStruct((Cout, 1), jnp.float32),
                   jax.ShapeDtypeStruct((Cout, 1), jnp.float32)),
        grid=(N,),
        in_specs=[pl.BlockSpec((1, Cout, HW), lambda n: (n, 0, 0))],
        out_specs=(pl.BlockSpec((Cout, 1), lambda n: (0, 0)),
                   pl.BlockSpec((Cout, 1), lambda n: (0, 0))),
        compiler_params=pltpu.CompilerParams(
            dimension_semantics=("arbitrary",),
            vmem_limit_bytes=_VMEM_LIMIT),
    )(u_flat)


def _bn_apply_concat_kernel(u_ref, x_ref, scale_ref, shift_ref, o_ref, *, cin):
    """Normalize (pre-folded scale/shift) and write [x | BN(u)] for one batch element."""
    o_ref[0, :cin, :] = x_ref[0]                         # skip connection (identity)
    o_ref[0, cin:, :] = u_ref[0] * scale_ref[...] + shift_ref[...]


def bn_apply_concat(u_flat, x_flat, scale, shift):
    """u_flat: (N, Cout, HW) f32, x_flat: (N, Cin, HW) f32 -> (N, Cin+Cout, HW) f32."""
    N, Cout, HW = u_flat.shape
    Cin = x_flat.shape[1]
    return pl.pallas_call(
        functools.partial(_bn_apply_concat_kernel, cin=Cin),
        out_shape=jax.ShapeDtypeStruct((N, Cin + Cout, HW), jnp.float32),
        grid=(N,),
        in_specs=[
            pl.BlockSpec((1, Cout, HW), lambda n: (n, 0, 0)),
            pl.BlockSpec((1, Cin, HW), lambda n: (n, 0, 0)),
            pl.BlockSpec((Cout, 1), lambda n: (0, 0)),
            pl.BlockSpec((Cout, 1), lambda n: (0, 0)),
        ],
        out_specs=pl.BlockSpec((1, Cin + Cout, HW), lambda n: (n, 0, 0)),
        compiler_params=pltpu.CompilerParams(
            dimension_semantics=("parallel",),
            vmem_limit_bytes=_VMEM_LIMIT),
    )(u_flat, x_flat, scale, shift)


# --------------------------------------------------------------------------
# Layout glue: transposed im2col + weight packing (plain JAX, no heavy compute)
# --------------------------------------------------------------------------

def _im2col_down_t(xc):
    """Conv2d(k=4, s=2, p=1) patches, channel-first input (C, N, H, W).
    Rows = (c, ky, kx) taps (c-major), columns = (n, ho, wo) output pixels."""
    C, N, H, W = xc.shape
    Ho, Wo = H // 2, W // 2
    xp = jnp.pad(xc, ((0, 0), (0, 0), (1, 1), (1, 1)))
    taps = [xp[:, :, ky:ky + 2 * Ho:2, kx:kx + 2 * Wo:2]
            for ky in range(4) for kx in range(4)]
    a = jnp.stack(taps, axis=1)                             # (C, 16, N, Ho, Wo)
    return a.reshape(C * 16, N * Ho * Wo)


def _im2col_up_t(dc):
    """Sub-pixel ConvTranspose2d(k=4, s=2, p=1) patches: 2x2 windows over the zero-padded
    down activation (C, N, Ho, Wo). Rows = (c, dy, dx), cols = (n, p, q) with p in [0,Ho],
    q in [0,Wo]; patch (p, q) produces the 2x2 output block at rows {2p-1, 2p}, cols {2q-1, 2q}."""
    C, N, Ho, Wo = dc.shape
    dp = jnp.pad(dc, ((0, 0), (0, 0), (1, 1), (1, 1)))
    taps = [dp[:, :, dy:dy + Ho + 1, dx:dx + Wo + 1]
            for dy in range(2) for dx in range(2)]
    a = jnp.stack(taps, axis=1)                             # (C, 4, N, Ho+1, Wo+1)
    return a.reshape(C * 4, N * (Ho + 1) * (Wo + 1))


def downconv_weight_t(w_down):
    """PyTorch Conv2d weight (Cout, Cin, 4, 4) -> (Cout, 16*Cin), column = c*16 + ky*4 + kx."""
    return w_down.reshape(w_down.shape[0], -1)


def upconv_weight_t(w_up):
    """PyTorch ConvTranspose2d weight (Cin, Cout, 4, 4) -> phase-packed (4*Cout, 4*Cin).
    Row = (oy*2+ox)*Cout + o (sub-pixel phase), column = c*4 + dy*2 + dx (window position);
    value = w_up[c, o, 2 + oy - 2*dy, 2 + ox - 2*dx]."""
    cin, cout = w_up.shape[0], w_up.shape[1]
    blocks = []
    for oy in range(2):
        for ox in range(2):
            sub = jnp.stack(
                [jnp.stack([w_up[:, :, 2 + oy - 2 * dy, 2 + ox - 2 * dx]
                            for dx in range(2)], axis=-1)
                 for dy in range(2)], axis=-2)              # (Cin, Cout, dy, dx)
            blocks.append(jnp.transpose(sub, (1, 0, 2, 3)).reshape(cout, cin * 4))
    return jnp.concatenate(blocks, axis=0)                  # (4*Cout, 4*Cin)


def _pad_lanes(a, tn_max):
    """Zero-pad the pixel (lane) axis to a multiple of the lane tile (<= tn_max, >= 128)."""
    m = a.shape[1]
    tn = min(tn_max, _round_up(m, 128))
    m_pad = _round_up(m, tn)
    if m_pad != m:
        a = jnp.pad(a, ((0, 0), (0, m_pad - m)))
    return a, tn


# --------------------------------------------------------------------------
# Forward pass (innermost UnetSkipConnectionBlock)
# --------------------------------------------------------------------------

def unet_innermost_forward(x_nchw, params, *, tn=512):
    N, Cin, H, W = x_nchw.shape
    Ho, Wo = H // 2, W // 2
    inner_nc = params["w_down_t"].shape[0]
    outer_nc = params["w_up_t"].shape[0] // 4

    # Channel-first view (Cin, N, H, W): one small boundary transpose; downstream the pixel
    # axis stays last (lane axis) until the final NCHW output.
    xc = jnp.transpose(x_nchw, (1, 0, 2, 3)).astype(jnp.bfloat16)

    # ---- down: LeakyReLU(0.2) -> Conv2d(Cin, inner_nc, 4, 2, 1, bias=False) ----
    a_dn = _im2col_down_t(xc)                               # (16*Cin, N*Ho*Wo) bf16
    m1 = a_dn.shape[1]
    a_dn, tn1 = _pad_lanes(a_dn, tn)
    d_t = act_matmul_t(params["w_down_t"], a_dn, act="leaky_relu",
                       out_dtype=jnp.bfloat16, tn=tn1)      # (inner_nc, m1_pad)
    d_c = d_t[:, :m1].reshape(inner_nc, N, Ho, Wo)

    # ---- up: ReLU -> ConvTranspose2d(inner_nc, outer_nc, 4, 2, 1, bias=False),
    #      sub-pixel decomposition (K = 4*inner_nc, no zero-dilated taps) ----
    a_up = _im2col_up_t(d_c)                                # (4*inner_nc, N*(Ho+1)*(Wo+1))
    m2 = a_up.shape[1]
    a_up, tn2 = _pad_lanes(a_up, tn)
    u_t = act_matmul_t(params["w_up_t"], a_up, act="relu",
                       out_dtype=jnp.float32, tn=tn2)       # (4*outer_nc, m2_pad)

    # sub-pixel interleave: (oy, ox, o, n, p, q) -> u[n, o, 2p-1+oy, 2q-1+ox]
    u = u_t[:, :m2].reshape(2, 2, outer_nc, N, Ho + 1, Wo + 1)
    u = jnp.transpose(u, (3, 2, 4, 0, 5, 1)).reshape(N, outer_nc, 2 * Ho + 2, 2 * Wo + 2)
    u = u[:, :, 1:2 * Ho + 1, 1:2 * Wo + 1]                 # (N, outer_nc, H, W) f32

    # ---- BatchNorm2d (training batch stats) + skip concat ----
    u_flat = u.reshape(N, outer_nc, H * W)
    x_flat = x_nchw.reshape(N, Cin, H * W)
    s, ss = bn_stats(u_flat)                                # (outer_nc, 1) each
    inv_count = 1.0 / float(N * H * W)
    mean = s * inv_count
    var = ss * inv_count - mean * mean                      # biased variance (BN training mode)
    inv = jax.lax.rsqrt(var + _BN_EPS)
    scale = params["gamma"].reshape(-1, 1) * inv            # tiny (Cout,1) XLA elementwise
    shift = params["beta"].reshape(-1, 1) - mean * scale
    out = bn_apply_concat(u_flat, x_flat, scale, shift)     # (N, Cin+Cout, HW), written once
    return out.reshape(N, Cin + outer_nc, H, W)


# --------------------------------------------------------------------------
# Pure-JAX f32 reference (PyTorch semantics, for sanity check only)
# --------------------------------------------------------------------------

def reference_forward(x_nchw, w_down, w_up, gamma, beta):
    lrelu = jnp.where(x_nchw >= 0, x_nchw, 0.2 * x_nchw)
    d = jax.lax.conv_general_dilated(
        lrelu, w_down, window_strides=(2, 2), padding=((1, 1), (1, 1)),
        dimension_numbers=("NCHW", "OIHW", "NCHW"))
    r = jnp.maximum(d, 0.0)
    w_direct = jnp.transpose(w_up, (1, 0, 2, 3))[:, :, ::-1, ::-1]
    u = jax.lax.conv_general_dilated(
        r, w_direct, window_strides=(1, 1), padding=((2, 2), (2, 2)),
        lhs_dilation=(2, 2), dimension_numbers=("NCHW", "OIHW", "NCHW"))
    mean = jnp.mean(u, axis=(0, 2, 3), keepdims=True)
    var = jnp.mean((u - mean) ** 2, axis=(0, 2, 3), keepdims=True)
    un = (u - mean) * jax.lax.rsqrt(var + _BN_EPS)
    un = un * gamma.reshape(1, -1, 1, 1) + beta.reshape(1, -1, 1, 1)
    return jnp.concatenate([x_nchw, un], axis=1)


# --------------------------------------------------------------------------

if __name__ == "__main__":
    # Module config: innermost block, outer_nc=4, inner_nc=8, input_nc=None -> 4,
    # norm_layer=BatchNorm2d -> use_bias=False.
    outer_nc, inner_nc = 4, 8
    input_nc = outer_nc
    N, H, W = 2, 16, 16

    key = jax.random.PRNGKey(0)
    kx_, kd, ku = jax.random.split(key, 3)
    x = jax.random.normal(kx_, (N, input_nc, H, W), jnp.float32)

    # Deterministic parameter init (shapes follow nn.Conv2d / nn.ConvTranspose2d / BatchNorm2d).
    w_down = 0.05 * jax.random.normal(kd, (inner_nc, input_nc, 4, 4), jnp.float32)   # Conv2d
    w_up = 0.05 * jax.random.normal(ku, (inner_nc, outer_nc, 4, 4), jnp.float32)     # ConvTranspose2d
    gamma = jnp.ones((outer_nc,), jnp.float32)   # BatchNorm2d default affine init
    beta = jnp.zeros((outer_nc,), jnp.float32)

    params = {
        "w_down_t": downconv_weight_t(w_down).astype(jnp.bfloat16),   # (inner_nc, 16*Cin)
        "w_up_t": upconv_weight_t(w_up).astype(jnp.bfloat16),         # (4*outer_nc, 4*inner_nc)
        "gamma": gamma,
        "beta": beta,
    }

    out = jax.jit(unet_innermost_forward)(x, params)
    out = jax.block_until_ready(out)
    assert out.shape == (N, input_nc + outer_nc, H, W), out.shape

    # Tolerance covers bf16 MXU inputs (eps = 2^-8) through two convs + batch-norm; the
    # skip-connection channels are exact f32 passthrough.
    ref = reference_forward(x, w_down, w_up, gamma, beta)
    max_err = float(jnp.max(jnp.abs(out - ref)))
    assert jnp.allclose(out, ref, atol=2e-2, rtol=2e-2), max_err

    print("KERNEL_OK")
</pallas_src>

<mosaic_0001>
module attributes {stable_mosaic.version = 11 : i64} {
  func.func @_act_matmul_t_kernel(%arg0: i32, %arg1: memref<8x64xbf16, #tpu.memory_space<vmem>>, %arg2: memref<64x128xbf16, #tpu.memory_space<vmem>>, %arg3: memref<8x128xbf16, #tpu.memory_space<vmem>>) attributes {dimension_semantics = [#tpu.dimension_semantics<parallel>], iteration_bounds = array<i64: 1>, scalar_prefetch = 0 : i64, scratch_operands = 0 : i64, tpu.core_type = #tpu.core_type<tc>, window_params = [{pipeline_mode = #tpu.pipeline_mode<synchronous>, transform_indices = @transform_0, window_bounds = array<i64: 8, 64>}, {transform_indices = @transform_1, window_bounds = array<i64: 64, 128>}, {transform_indices = @transform_2, window_bounds = array<i64: 8, 128>}]} {
    %c0 = arith.constant 0 : index
    %c0_0 = arith.constant 0 : index
    %0 = vector.load %arg2[%c0, %c0_0] : memref<64x128xbf16, #tpu.memory_space<vmem>>, vector<64x128xbf16>
    %1 = arith.extf %0 : vector<64x128xbf16> to vector<64x128xf32>
    %cst = arith.constant 0.000000e+00 : f32
    %2 = vector.broadcast %cst : f32 to vector<64x128xf32>
    %3 = arith.cmpf oge, %1, %2 : vector<64x128xf32>
    %cst_1 = arith.constant 2.000000e-01 : f32
    %4 = vector.broadcast %cst_1 : f32 to vector<64x128xf32>
    %5 = arith.mulf %4, %1 : vector<64x128xf32>
    %6 = arith.select %3, %1, %5 : vector<64x128xi1>, vector<64x128xf32>
    %7 = arith.truncf %6 : vector<64x128xf32> to vector<64x128xbf16>
    %c0_2 = arith.constant 0 : index
    %c0_3 = arith.constant 0 : index
    %8 = vector.load %arg1[%c0_2, %c0_3] : memref<8x64xbf16, #tpu.memory_space<vmem>>, vector<8x64xbf16>
    %cst_4 = arith.constant dense<0.000000e+00> : vector<8x128xf32>
    %9 = tpu.matmul %8, %7, %cst_4 {dimension_numbers = #tpu.dot_dimension_numbers<[1], [0], [0], [1], [0, 0, 1, 1], [], []>} : vector<8x64xbf16>, vector<64x128xbf16>, vector<8x128xf32> -> vector<8x128xf32>
    %10 = arith.truncf %9 : vector<8x128xf32> to vector<8x128xbf16>
    %c0_5 = arith.constant 0 : index
    %c0_6 = arith.constant 0 : index
    %11 = vector.load %arg3[%c0_5, %c0_6] : memref<8x128xbf16, #tpu.memory_space<vmem>>, vector<8x128xbf16>
    tpu.vector_store %arg3[%c0_5, %c0_6], %10 {strides = array<i32>} : memref<8x128xbf16, #tpu.memory_space<vmem>>, vector<8x128xbf16>,
    return
  }
  func.func @transform_0(%arg0: i32) -> (i32, i32) {
    %c0_i32 = arith.constant 0 : i32
    %c0_i32_0 = arith.constant 0 : i32
    %c0_i32_1 = arith.constant 0 : i32
    return %c0_i32, %c0_i32_0 : i32, i32
  }
  func.func @transform_1(%arg0: i32) -> (i32, i32) {
    %c0_i32 = arith.constant 0 : i32
    %c0_i32_0 = arith.constant 0 : i32
    return %c0_i32, %arg0 : i32, i32
  }
  func.func @transform_2(%arg0: i32) -> (i32, i32) {
    %c0_i32 = arith.constant 0 : i32
    %c0_i32_0 = arith.constant 0 : i32
    return %c0_i32, %arg0 : i32, i32
  }
}

module attributes {stable_mosaic.version = 11 : i64} {
  func.func @_act_matmul_t_kernel(%arg0: i32, %arg1: memref<16x32xbf16, #tpu.memory_space<vmem>>, %arg2: memref<32x256xbf16, #tpu.memory_space<vmem>>, %arg3: memref<16x256xf32, #tpu.memory_space<vmem>>) attributes {dimension_semantics = [#tpu.dimension_semantics<parallel>], iteration_bounds = array<i64: 1>, scalar_prefetch = 0 : i64, scratch_operands = 0 : i64, tpu.core_type = #tpu.core_type<tc>, window_params = [{pipeline_mode = #tpu.pipeline_mode<synchronous>, transform_indices = @transform_0, window_bounds = array<i64: 16, 32>}, {transform_indices = @transform_1, window_bounds = array<i64: 32, 256>}, {transform_indices = @transform_2, window_bounds = array<i64: 16, 256>}]} {
    %c0 = arith.constant 0 : index
    %c0_0 = arith.constant 0 : index
    %0 = vector.load %arg2[%c0, %c0_0] : memref<32x256xbf16, #tpu.memory_space<vmem>>, vector<32x256xbf16>
    %1 = arith.extf %0 : vector<32x256xbf16> to vector<32x256xf32>
    %cst = arith.constant 0.000000e+00 : f32
    %2 = vector.broadcast %cst : f32 to vector<32x256xf32>
    %3 = arith.maximumf %1, %2 : vector<32x256xf32>
    %4 = arith.truncf %3 : vector<32x256xf32> to vector<32x256xbf16>
    %c0_1 = arith.constant 0 : index
    %c0_2 = arith.constant 0 : index
    %5 = vector.load %arg1[%c0_1, %c0_2] : memref<16x32xbf16, #tpu.memory_space<vmem>>, vector<16x32xbf16>
    %cst_3 = arith.constant dense<0.000000e+00> : vector<16x256xf32>
    %6 = tpu.matmul %5, %4, %cst_3 {dimension_numbers = #tpu.dot_dimension_numbers<[1], [0], [0], [1], [0, 0, 1, 1], [], []>} : vector<16x32xbf16>, vector<32x256xbf16>, vector<16x256xf32> -> vector<16x256xf32>
    %c0_4 = arith.constant 0 : index
    %c0_5 = arith.constant 0 : index
    %7 = vector.load %arg3[%c0_4, %c0_5] : memref<16x256xf32, #tpu.memory_space<vmem>>, vector<16x256xf32>
    tpu.vector_store %arg3[%c0_4, %c0_5], %6 {strides = array<i32>} : memref<16x256xf32, #tpu.memory_space<vmem>>, vector<16x256xf32>,
    return
  }
  func.func @transform_0(%arg0: i32) -> (i32, i32) {
    %c0_i32 = arith.constant 0 : i32
    %c0_i32_0 = arith.constant 0 : i32
    %c0_i32_1 = arith.constant 0 : i32
    return %c0_i32, %c0_i32_0 : i32, i32
  }
  func.func @transform_1(%arg0: i32) -> (i32, i32) {
    %c0_i32 = arith.constant 0 : i32
    %c0_i32_0 = arith.constant 0 : i32
    return %c0_i32, %arg0 : i32, i32
  }
  func.func @transform_2(%arg0: i32) -> (i32, i32) {
    %c0_i32 = arith.constant 0 : i32
    %c0_i32_0 = arith.constant 0 : i32
    return %c0_i32, %arg0 : i32, i32
  }
}

module attributes {stable_mosaic.version = 11 : i64} {
  func.func @_bn_stats_kernel(%arg0: i32, %arg1: memref<1x4x256xf32, #tpu.memory_space<vmem>>, %arg2: memref<4x1xf32, #tpu.memory_space<vmem>>, %arg3: memref<4x1xf32, #tpu.memory_space<vmem>>) attributes {dimension_semantics = [#tpu.dimension_semantics<arbitrary>], iteration_bounds = array<i64: 2>, scalar_prefetch = 0 : i64, scratch_operands = 0 : i64, tpu.core_type = #tpu.core_type<tc>, window_params = [{transform_indices = @transform_0, window_bounds = array<i64: 1, 4, 256>}, {pipeline_mode = #tpu.pipeline_mode<synchronous>, transform_indices = @transform_1, window_bounds = array<i64: 4, 1>}, {pipeline_mode = #tpu.pipeline_mode<synchronous>, transform_indices = @transform_2, window_bounds = array<i64: 4, 1>}]} {
    %c0_i32 = arith.constant 0 : i32
    %0 = arith.cmpi eq, %arg0, %c0_i32 : i32
    %1 = arith.extui %0 : i1 to i32
    %c0_i32_0 = arith.constant 0 : i32
    %2 = arith.cmpi ne, %1, %c0_i32_0 : i32
    scf.if %2 {
      %cst_12 = arith.constant 0.000000e+00 : f32
      %16 = vector.broadcast %cst_12 : f32 to vector<4x1xf32>
      %c0_13 = arith.constant 0 : index
      %c0_14 = arith.constant 0 : index
      %17 = vector.load %arg2[%c0_13, %c0_14] : memref<4x1xf32, #tpu.memory_space<vmem>>, vector<4x1xf32>
      tpu.vector_store %arg2[%c0_13, %c0_14], %16 {strides = array<i32>} : memref<4x1xf32, #tpu.memory_space<vmem>>, vector<4x1xf32>,
      %cst_15 = arith.constant 0.000000e+00 : f32
      %18 = vector.broadcast %cst_15 : f32 to vector<4x1xf32>
      %c0_16 = arith.constant 0 : index
      %c0_17 = arith.constant 0 : index
      %19 = vector.load %arg3[%c0_16, %c0_17] : memref<4x1xf32, #tpu.memory_space<vmem>>, vector<4x1xf32>
      tpu.vector_store %arg3[%c0_16, %c0_17], %18 {strides = array<i32>} : memref<4x1xf32, #tpu.memory_space<vmem>>, vector<4x1xf32>,
    } else {
    }
    %c0 = arith.constant 0 : index
    %c0_1 = arith.constant 0 : index
    %c0_2 = arith.constant 0 : index
    %3 = vector.load %arg1[%c0, %c0_1, %c0_2] : memref<1x4x256xf32, #tpu.memory_space<vmem>>, vector<1x4x256xf32>
    %4 = vector.shape_cast %3 : vector<1x4x256xf32> to vector<4x256xf32>
    %c0_3 = arith.constant 0 : index
    %c0_4 = arith.constant 0 : index
    %5 = vector.load %arg2[%c0_3, %c0_4] : memref<4x1xf32, #tpu.memory_space<vmem>>, vector<4x1xf32>
    %cst = arith.constant dense<0.000000e+00> : vector<4xf32>
    %6 = vector.multi_reduction <add>, %4, %cst [1] : vector<4x256xf32> to vector<4xf32>
    %7 = vector.shape_cast %6 : vector<4xf32> to vector<4x1xf32>
    %8 = arith.addf %5, %7 : vector<4x1xf32>
    %c0_5 = arith.constant 0 : index
    %c0_6 = arith.constant 0 : index
    %9 = vector.load %arg2[%c0_5, %c0_6] : memref<4x1xf32, #tpu.memory_space<vmem>>, vector<4x1xf32>
    tpu.vector_store %arg2[%c0_5, %c0_6], %8 {strides = array<i32>} : memref<4x1xf32, #tpu.memory_space<vmem>>, vector<4x1xf32>,
    %c0_7 = arith.constant 0 : index
    %c0_8 = arith.constant 0 : index
    %10 = vector.load %arg3[%c0_7, %c0_8] : memref<4x1xf32, #tpu.memory_space<vmem>>, vector<4x1xf32>
    %11 = arith.mulf %4, %4 : vector<4x256xf32>
    %cst_9 = arith.constant dense<0.000000e+00> : vector<4xf32>
    %12 = vector.multi_reduction <add>, %11, %cst_9 [1] : vector<4x256xf32> to vector<4xf32>
    %13 = vector.shape_cast %12 : vector<4xf32> to vector<4x1xf32>
    %14 = arith.addf %10, %13 : vector<4x1xf32>
    %c0_10 = arith.constant 0 : index
    %c0_11 = arith.constant 0 : index
    %15 = vector.load %arg3[%c0_10, %c0_11] : memref<4x1xf32, #tpu.memory_space<vmem>>, vector<4x1xf32>
    tpu.vector_store %arg3[%c0_10, %c0_11], %14 {strides = array<i32>} : memref<4x1xf32, #tpu.memory_space<vmem>>, vector<4x1xf32>,
    return
  }
  func.func @transform_0(%arg0: i32) -> (i32, i32, i32) {
    %c0_i32 = arith.constant 0 : i32
    %c0_i32_0 = arith.constant 0 : i32
    %c0_i32_1 = arith.constant 0 : i32
    return %arg0, %c0_i32, %c0_i32_0 : i32, i32, i32
  }
  func.func @transform_1(%arg0: i32) -> (i32, i32) {
    %c0_i32 = arith.constant 0 : i32
    %c0_i32_0 = arith.constant 0 : i32
    %c0_i32_1 = arith.constant 0 : i32
    return %c0_i32, %c0_i32_0 : i32, i32
  }
  func.func @transform_2(%arg0: i32) -> (i32, i32) {
    %c0_i32 = arith.constant 0 : i32
    %c0_i32_0 = arith.constant 0 : i32
    %c0_i32_1 = arith.constant 0 : i32
    return %c0_i32, %c0_i32_0 : i32, i32
  }
}

module attributes {stable_mosaic.version = 11 : i64} {
  func.func @_bn_apply_concat_kernel(%arg0: i32, %arg1: memref<1x4x256xf32, #tpu.memory_space<vmem>>, %arg2: memref<1x4x256xf32, #tpu.memory_space<vmem>>, %arg3: memref<4x1xf32, #tpu.memory_space<vmem>>, %arg4: memref<4x1xf32, #tpu.memory_space<vmem>>, %arg5: memref<1x8x256xf32, #tpu.memory_space<vmem>>) attributes {dimension_semantics = [#tpu.dimension_semantics<parallel>], iteration_bounds = array<i64: 2>, scalar_prefetch = 0 : i64, scratch_operands = 0 : i64, tpu.core_type = #tpu.core_type<tc>, window_params = [{transform_indices = @transform_0, window_bounds = array<i64: 1, 4, 256>}, {transform_indices = @transform_1, window_bounds = array<i64: 1, 4, 256>}, {pipeline_mode = #tpu.pipeline_mode<synchronous>, transform_indices = @transform_2, window_bounds = array<i64: 4, 1>}, {pipeline_mode = #tpu.pipeline_mode<synchronous>, transform_indices = @transform_3, window_bounds = array<i64: 4, 1>}, {transform_indices = @transform_4, window_bounds = array<i64: 1, 8, 256>}]} {
    %c0 = arith.constant 0 : index
    %c0_0 = arith.constant 0 : index
    %c0_1 = arith.constant 0 : index
    %0 = vector.load %arg2[%c0, %c0_0, %c0_1] : memref<1x4x256xf32, #tpu.memory_space<vmem>>, vector<1x4x256xf32>
    %1 = vector.shape_cast %0 : vector<1x4x256xf32> to vector<4x256xf32>
    %c0_2 = arith.constant 0 : index
    %c0_3 = arith.constant 0 : index
    %c0_4 = arith.constant 0 : index
    %2 = vector.load %arg5[%c0_2, %c0_3, %c0_4] : memref<1x8x256xf32, #tpu.memory_space<vmem>>, vector<1x4x256xf32>
    %3 = vector.shape_cast %2 : vector<1x4x256xf32> to vector<4x256xf32>
    %4 = vector.shape_cast %1 : vector<4x256xf32> to vector<1x4x256xf32>
    tpu.vector_store %arg5[%c0_2, %c0_3, %c0_4], %4 {strides = array<i32>} : memref<1x8x256xf32, #tpu.memory_space<vmem>>, vector<1x4x256xf32>,
    %c0_5 = arith.constant 0 : index
    %c0_6 = arith.constant 0 : index
    %c0_7 = arith.constant 0 : index
    %5 = vector.load %arg1[%c0_5, %c0_6, %c0_7] : memref<1x4x256xf32, #tpu.memory_space<vmem>>, vector<1x4x256xf32>
    %6 = vector.shape_cast %5 : vector<1x4x256xf32> to vector<4x256xf32>
    %c0_8 = arith.constant 0 : index
    %c0_9 = arith.constant 0 : index
    %7 = vector.load %arg3[%c0_8, %c0_9] : memref<4x1xf32, #tpu.memory_space<vmem>>, vector<4x1xf32>
    %8 = vector.broadcast %7 : vector<4x1xf32> to vector<4x256xf32>
    %9 = arith.mulf %6, %8 : vector<4x256xf32>
    %c0_10 = arith.constant 0 : index
    %c0_11 = arith.constant 0 : index
    %10 = vector.load %arg4[%c0_10, %c0_11] : memref<4x1xf32, #tpu.memory_space<vmem>>, vector<4x1xf32>
    %11 = vector.broadcast %10 : vector<4x1xf32> to vector<4x256xf32>
    %12 = arith.addf %9, %11 : vector<4x256xf32>
    %c0_12 = arith.constant 0 : index
    %c4 = arith.constant 4 : index
    %c0_13 = arith.constant 0 : index
    %13 = vector.load %arg5[%c0_12, %c4, %c0_13] : memref<1x8x256xf32, #tpu.memory_space<vmem>>, vector<1x4x256xf32>
    %14 = vector.shape_cast %13 : vector<1x4x256xf32> to vector<4x256xf32>
    %15 = vector.shape_cast %12 : vector<4x256xf32> to vector<1x4x256xf32>
    tpu.vector_store %arg5[%c0_12, %c4, %c0_13], %15 {strides = array<i32>} : memref<1x8x256xf32, #tpu.memory_space<vmem>>, vector<1x4x256xf32>,
    return
  }
  func.func @transform_0(%arg0: i32) -> (i32, i32, i32) {
    %c0_i32 = arith.constant 0 : i32
    %c0_i32_0 = arith.constant 0 : i32
    %c0_i32_1 = arith.constant 0 : i32
    return %arg0, %c0_i32, %c0_i32_0 : i32, i32, i32
  }
  func.func @transform_1(%arg0: i32) -> (i32, i32, i32) {
    %c0_i32 = arith.constant 0 : i32
    %c0_i32_0 = arith.constant 0 : i32
    %c0_i32_1 = arith.constant 0 : i32
    return %arg0, %c0_i32, %c0_i32_0 : i32, i32, i32
  }
  func.func @transform_2(%arg0: i32) -> (i32, i32) {
    %c0_i32 = arith.constant 0 : i32
    %c0_i32_0 = arith.constant 0 : i32
    %c0_i32_1 = arith.constant 0 : i32
    return %c0_i32, %c0_i32_0 : i32, i32
  }
  func.func @transform_3(%arg0: i32) -> (i32, i32) {
    %c0_i32 = arith.constant 0 : i32
    %c0_i32_0 = arith.constant 0 : i32
    %c0_i32_1 = arith.constant 0 : i32
    return %c0_i32, %c0_i32_0 : i32, i32
  }
  func.func @transform_4(%arg0: i32) -> (i32, i32, i32) {
    %c0_i32 = arith.constant 0 : i32
    %c0_i32_0 = arith.constant 0 : i32
    %c0_i32_1 = arith.constant 0 : i32
    return %arg0, %c0_i32, %c0_i32_0 : i32, i32, i32
  }
}

</mosaic_0001>

<bundles_post_ra>
// kernel: unet_innermost_forward.4
= control target key start
LH: loop header
LB: loop body
LE: loop exit
PB: predicated region body
PF: predicated region fallthrough
CT: control target
= control target key end

     0   :  { %v146_v0 = vmov 0.0   ;;  %vm147_vm0 = vmmov 0   ;;  %vm57_vm9 = vcmask 523264   ;;  %s181_s1 = inlined_call_operand.vmem [shape: bf16[64,128], index: 1, kind: input, shape index: {}]   ;;  %s182_s0 = inlined_call_operand.vmem [shape: bf16[8,64], index: 0, kind: input, shape index: {}]   ;;  %s183_s2 = inlined_call_operand.vmem [shape: bf16[8,128], index: 2, kind: output, shape index: {}]  }
   0x1   :  { %132 = vmatprep.subr.bf16.mxu0 %v146_v0  ;;  %v109_v1 = vld [vmem:[%s181_s1] sm:$0xff]   ;;  %v124_v2 = vld [vmem:[%s181_s1 + $0x8] sm:$0xff]   ;;  %v125_v3 = vld [vmem:[%s181_s1 + $0x10] sm:$0xff]   ;;  %140 = vmatprep.mubr.msk.bf16.mxu0 %vm147_vm0, %v146_v0 }
   0x2   :  { %v110_v4 = vunpack.c.l.bf16 %v109_v1  ;;  %v111_v5 = vunpack.c.h.bf16 %v109_v1  ;;  %v114_v6 = vunpack.c.l.bf16 %v124_v2  ;;  %v115_v7 = vunpack.c.h.bf16 %v124_v2  ;;  %v126_v8 = vld [vmem:[%s181_s1 + $0x18] sm:$0xff]   ;;  %v56_v33 = vld [vmem:[%s182_s0] sm:$0xf] }
   0x3   :  { %v118_v9 = vunpack.c.l.bf16 %v125_v3  ;;  %v119_v10 = vunpack.c.h.bf16 %v125_v3  ;;  %v122_v11 = vunpack.c.l.bf16 %v126_v8  ;;  %v123_v12 = vunpack.c.h.bf16 %v126_v8 }
   0x4   :  { %vm28_vm1 = vcmp.ge.f32.partialorder %v110_v4, 0.0  ;;  %vm29_vm2 = vcmp.ge.f32.partialorder %v111_v5, 0.0  ;;  %v36_v13 = vmul.f32 0.2, %v110_v4  ;;  %v37_v14 = vmul.f32 0.2, %v111_v5 }
   0x5   :  { %vm30_vm3 = vcmp.ge.f32.partialorder %v114_v6, 0.0  ;;  %vm31_vm4 = vcmp.ge.f32.partialorder %v115_v7, 0.0  ;;  %v38_v15 = vmul.f32 0.2, %v114_v6  ;;  %v39_v16 = vmul.f32 0.2, %v115_v7 }
   0x6   :  { %v44_v17 = vsel %vm28_vm1, %v110_v4, %v36_v13  ;;  %v45_v18 = vsel %vm29_vm2, %v111_v5, %v37_v14  ;;  %vm32_vm5 = vcmp.ge.f32.partialorder %v118_v9, 0.0  ;;  %vm33_vm6 = vcmp.ge.f32.partialorder %v119_v10, 0.0 }
   0x7   :  { %v52_v19 = vpack.c.bf16 %v45_v18, %v44_v17  ;;  %v46_v20 = vsel %vm30_vm3, %v114_v6, %v38_v15  ;;  %v47_v21 = vsel %vm31_vm4, %v115_v7, %v39_v16  ;;  %v40_v22 = vmul.f32 0.2, %v118_v9 }
   0x8   :  { %v41_v23 = vmul.f32 0.2, %v119_v10  ;;  %v53_v24 = vpack.c.bf16 %v47_v21, %v46_v20  ;;  %v42_v27 = vmul.f32 0.2, %v122_v11  ;;  %v43_v28 = vmul.f32 0.2, %v123_v12 }
   0x9   :  { %133 = vmatpush3.bf16.msra.mxu0 %v52_v19  ;;  %v48_v25 = vsel %vm32_vm5, %v118_v9, %v40_v22  ;;  %vm34_vm7 = vcmp.ge.f32.partialorder %v122_v11, 0.0  ;;  %vm35_vm8 = vcmp.ge.f32.partialorder %v123_v12, 0.0 }
   0xa   :  { %134 = vmatprep.subr.bf16.mxu0 %v146_v0  ;;  %v49_v26 = vsel %vm33_vm6, %v119_v10, %v41_v23  ;;  %v50_v30 = vsel %vm34_vm7, %v122_v11, %v42_v27  ;;  %v51_v31 = vsel %vm35_vm8, %v123_v12, %v43_v28 }
   0xb   :  { %v54_v29 = vpack.c.bf16 %v49_v26, %v48_v25  ;;  %v55_v32 = vpack.c.bf16 %v51_v31, %v50_v30 }
   0xd   :  { %135 = vmatpush3.bf16.msra.mxu0 %v53_v24 }
   0xe   :  { %136 = vmatprep.subr.bf16.mxu0 %v146_v0 }
  0x11   :  { %137 = vmatpush3.bf16.msra.mxu0 %v54_v29 }
  0x12   :  { %138 = vmatprep.subr.bf16.mxu0 %v146_v0 }
  0x15   :  { %139 = vmatpush3.bf16.msra.mxu0 %v55_v32 }
  0x18   :  { %141 = vmatmul.mubr.msk.bf16.vlgmr.msra.gmra.mrb[0].mxu0 %vm57_vm9, %v56_v33 }
  0xeb   :  { %v95_v34 = vpop.f32.mrb[0].mxu0 }
  0xec   :  { %v101_v35 = vpack.c.bf16 %v95_v34, %v95_v34  ;;  %v142_v36 = vpop.f32.mrb[1].mxu0 }
  0xed   :  { %v98_v37 = vpop.f32.mrb[2].mxu0 }
  0xee   :  { %102 = vst [vmem:[%s183_s2] sm:$0xf] %v101_v35  ;;  %v143_v38 = vpop.f32.mrb[3].mxu0 }

// kernel: unet_innermost_forward.5
= control target key start
LH: loop header
LB: loop body
LE: loop exit
PB: predicated region body
PF: predicated region fallthrough
CT: control target
= control target key end

     0   :  { %v102_v3 = vmov 0   ;;  %vm43_vm0 = vcmask 261120   ;;  %s145_s1 = inlined_call_operand.vmem [shape: bf16[32,256], index: 1, kind: input, shape index: {}]   ;;  %s146_s0 = inlined_call_operand.vmem [shape: bf16[16,32], index: 0, kind: input, shape index: {}]   ;;  %s147_s2 = inlined_call_operand.vmem [shape: f32[16,256], index: 2, kind: output, shape index: {}]  }
   0x1   :  { %v12_v0 = vld [vmem:[%s145_s1] sm:$0xff]  ;;  %v13_v1 = vld [vmem:[%s145_s1 + $0x8] sm:$0xff]  ;;  %v14_v2 = vld [vmem:[%s145_s1 + $0x10] sm:$0xff]  ;;  %79 = vmatprep.mubr.bf16.mxu0 %v102_v3 }
   0x2   :  { %v17_v4 = vunpack.c.h.bf16 %v12_v0  ;;  %v19_v5 = vunpack.c.h.bf16 %v13_v1  ;;  %v16_v6 = vunpack.c.l.bf16 %v12_v0  ;;  %v18_v7 = vunpack.c.l.bf16 %v13_v1  ;;  %v15_v8 = vld [vmem:[%s145_s1 + $0x18] sm:$0xff]  ;;  %v101_v25 = vld [vmem:[%s146_s0] sm:$0xff]  }
   0x3   :  { %v21_v9 = vunpack.c.h.bf16 %v14_v2  ;;  %v23_v10 = vunpack.c.h.bf16 %v15_v8  ;;  %v20_v11 = vunpack.c.l.bf16 %v14_v2  ;;  %v22_v12 = vunpack.c.l.bf16 %v15_v8 }
   0x4   :  { %v25_v13 = vmax.f32 %v17_v4, 0.0  ;;  %v27_v14 = vmax.f32 %v19_v5, 0.0  ;;  %v24_v15 = vmax.f32 %v16_v6, 0.0  ;;  %v26_v16 = vmax.f32 %v18_v7, 0.0 }
   0x5   :  { %v29_v17 = vmax.f32 %v21_v9, 0.0  ;;  %v31_v18 = vmax.f32 %v23_v10, 0.0  ;;  %v28_v19 = vmax.f32 %v20_v11, 0.0  ;;  %v30_v20 = vmax.f32 %v22_v12, 0.0 }
   0x6   :  { %v33_v21 = vpack.c.bf16 %v27_v14, %v25_v13  ;;  %v32_v22 = vpack.c.bf16 %v26_v16, %v24_v15 }
   0x7   :  { %v35_v23 = vpack.c.bf16 %v31_v18, %v29_v17  ;;  %v34_v24 = vpack.c.bf16 %v30_v20, %v28_v19 }
   0x8   :  { %47 = vmatprep.subr.bf16.mxu0 %v33_v21 }
   0x9   :  { %48 = vmatpush1.bf16.msra.mxu0 %v32_v22 }
   0xa   :  { %49 = vmatprep.subr.bf16.mxu0 %v35_v23 }
   0xd   :  { %50 = vmatpush1.bf16.msra.mxu0 %v34_v24 }
  0x10   :  { %99 = vmatmul.mubr.msk.bf16.vlgmr.msra.gmra.mrb[0].mxu0 %vm43_vm0, %v101_v25 }
  0xe3   :  { %v81_v26 = vpop.f32.mrb[0].mxu0 }
  0xe4   :  { %90 = vst [vmem:[%s147_s2] sm:$0xff] %v81_v26  ;;  %v83_v27 = vpop.f32.mrb[1].mxu0 }
  0xe5   :  { %91 = vst [vmem:[%s147_s2 + $0x8] sm:$0xff] %v83_v27  ;;  %v85_v28 = vpop.f32.mrb[2].mxu0 }
  0xe6   :  { %92 = vst [vmem:[%s147_s2 + $0x10] sm:$0xff] %v85_v28  ;;  %v87_v29 = vpop.f32.mrb[3].mxu0 }
  0xe7   :  { %93 = vst [vmem:[%s147_s2 + $0x18] sm:$0xff] %v87_v29 }

// kernel: unet_innermost_forward.6
= control target key start
LH: loop header
LB: loop body
LE: loop exit
PB: predicated region body
PF: predicated region fallthrough
CT: control target
= control target key end

     0   :  { %s238_s9 = smov 0   ;;  %s270_s0 = inlined_call_operand.vmem [shape: f32[2,4,256], index: 0, kind: input, shape index: {}]   ;;  %s271_s1 = inlined_call_operand.vmem [shape: f32[4,1], index: 1, kind: output, shape index: {0}]   ;;  %s272_s2 = inlined_call_operand.vmem [shape: f32[4,1], index: 2, kind: output, shape index: {1}]  }
   0x1 LB: > { %s194_s10 = sadd.s32 4294967295, %s220_s9   ;;  %p197_p0 = scmp.ge.s32.totalorder %s220_s9, 1  ;;  %s220_s9 = sphi %s238_s9, %s13_s9  }
   0x2   : > { %p105_p1 = scmp.lt.s32.totalorder %s220_s9, 3 }
   0x4   : > { %p106_p2 = pnand %p197_p0, %p105_p1 }
   0x5   : > { %p122_p3 = scmp.lt.s32.totalorder (!%p106_p2), %s194_s10, 1  ;;  %p200_p4 = scmp.ne.s32.totalorder (!%p106_p2), %s194_s10, 0 }
   0x6   : > { %109 = sbr.rel (%p106_p2) target bundleno = 176 (0xb0), region = 24 }
   0xd   : > { %s123_s11 = scalar_select %p122_p3, %s194_s10, 1 }
   0xe   : > { %130 = sbr.rel (%p200_p4) target bundleno = 21 (0x15), region = 28  ;;  %vm131_vm0 = vcmask (!%p200_p4), 3072   ;;  %v222_v0 = vmov (!%p200_p4), 0.0  }
   0xf   : > { %s203_s12 = sshll.u32 %s123_s11, 3  ;;  %132 = vst.msk [vmem:[%s271_s1] sm:$0xf] (!%p200_p4), %vm131_vm0, %v222_v0  ;;  %133 = vst.msk [vmem:[%s272_s2] sm:$0xf] (!%p200_p4), %vm131_vm0, %v222_v0 }
  0x10   : > { %s126_s15 = scalar_lea.vmem %s270_s0, %s203_s12 }
  0x15 PF: > { %v134_v1 = vld [vmem:[%s126_s15] sm:$0xff]  ;;  %vm139_vm1 = vcmask 1043456   ;;  %vm146_vm2 = vcmask 3072  }
  0x16   : > { %v137_v2 = vcombine.high %v134_v1, %v134_v1  ;;  %v140_v3 = vsel %vm139_vm1, %v134_v1, 0.0  ;;  %v149_v4 = vmul.f32 %v134_v1, %v134_v1  ;;  %v135_v11 = vld [vmem:[%s271_s1] sm:$0xf] }
  0x17   : > { %v148_v14 = vld [vmem:[%s272_s2] sm:$0xf] }
  0x18   : > { %v141_v5 = vsel %vm139_vm1, %v137_v2, 0.0  ;;  %v151_v6 = vcombine.high %v149_v4, %v149_v4  ;;  %v153_v7 = vsel %vm139_vm1, %v149_v4, 0.0 }
  0x19   : > { %v142_v8 = vadd.f32 %v141_v5, %v140_v3 }
  0x1a   : > { %v154_v9 = vsel %vm139_vm1, %v151_v6, 0.0 }
  0x1b   : > { %143 = vadd.xlane.f32.xlu0 %v142_v8  ;;  %v155_v10 = vadd.f32 %v154_v9, %v153_v7 }
  0x1f   : > { %156 = vadd.xlane.f32.xlu0 %v155_v10 }
  0xa8   : > { %v144_v12 = vpop.xlane.xlu0 %143 }
  0xa9   : > { %v145_v13 = vadd.f32 %v144_v12, %v135_v11 }
  0xab   : > { %147 = vst.msk [vmem:[%s271_s1] sm:$0xf] %vm146_vm2, %v145_v13 }
  0xac   : > { %v157_v15 = vpop.xlane.xlu0 %156 }
  0xad   : > { %v158_v16 = vadd.f32 %v157_v15, %v148_v14 }
  0xaf   : > { %159 = vst.msk [vmem:[%s272_s2] sm:$0xf] %vm146_vm2, %v158_v16 }
  0xb0 PF: > { %s13_s9 = sadd.s32 1, %s220_s9  }
  0xb1   : > { %p10_p5 = scmp.ge.s32.totalorder %s13_s9, 4  }
  0xb3   :  { %12 = sbr.rel (!%p10_p5) target bundleno = 1 (0x1), region = 62 }

// kernel: unet_innermost_forward.7
= control target key start
LH: loop header
LB: loop body
LE: loop exit
PB: predicated region body
PF: predicated region fallthrough
CT: control target
= control target key end

     0   :  { %s388_s15 = smov 0   ;;  %s414_s0 = inlined_call_operand.vmem [shape: f32[2,4,256], index: 0, kind: input, shape index: {}]   ;;  %s415_s1 = inlined_call_operand.vmem [shape: f32[2,4,256], index: 1, kind: input, shape index: {}]   ;;  %s416_s2 = inlined_call_operand.vmem [shape: f32[4,1], index: 2, kind: input, shape index: {}]   ;;  %s417_s3 = inlined_call_operand.vmem [shape: f32[4,1], index: 3, kind: input, shape index: {}]   ;;  %s418_s4 = inlined_call_operand.vmem [shape: f32[2,8,256], index: 4, kind: output, shape index: {}]  }
   0x1 LB: > { %s325_s16 = sadd.s32 4294967295, %s359_s15   ;;  %p329_p0 = scmp.ge.s32.totalorder %s359_s15, 1  ;;  %s359_s15 = sphi %s388_s15, %s14_s15  }
   0x2   : > { %p172_p1 = scmp.lt.s32.totalorder %s359_s15, 3 }
   0x4   : > { %p173_p2 = pnand %p329_p0, %p172_p1 }
   0x5   : > { %v225_v0 = vld [vmem:[%s416_s2] sm:$0xf] (!%p173_p2)  ;;  %p203_p3 = scmp.lt.s32.totalorder (!%p173_p2), %s325_s16, 1  ;;  %v361_v1 = vmov (!%p173_p2), 0   ;;  %v362_v5 = vmov (!%p173_p2), 839922192   ;;  %v233_v7 = vlaneseq (!%p173_p2) }
   0x6   : > { %176 = sbr.rel (%p173_p2) target bundleno = 146 (0x92), region = 36  ;;  %351 = vset.pattern.permute.xlu0 (!%p173_p2), %v361_v1  ;;  %v239_v2 = vld [vmem:[%s417_s3] sm:$0xf] (!%p173_p2)  ;;  %v231_v6 = vunpack.c.l.s4 (!%p173_p2), %v362_v5 }
   0x7   : > { %228 = vperm.xlu0 (!%p173_p2), %351, %v225_v0   ;;  %v234_v9 = vshrl.u32 (!%p173_p2), %v233_v7, 7 }
   0x8   : > { %v232_v8 = vunpack.c.0.s8 (!%p173_p2), %v231_v6 }
   0xa   : > { %v235_v10 = vsub.s32 (!%p173_p2), %v232_v8, %v234_v9 }
   0xb   : > { %242 = vperm.xlu0 (!%p173_p2), %351, %v239_v2  }
   0xd   : > { %s420_s16 = smov (!%p203_p3, %s325_s16), 1 }
   0xe   : > { %s338_s21 = sshll.u32 %s420_s16, 3  ;;  %s340_s22 = sshll.u32 %s420_s16, 4 }
   0xf   : > { %s212_s25 = scalar_lea.vmem %s415_s1, %s338_s21  ;;  %s217_s28 = scalar_lea.vmem %s418_s4, %s340_s22 }
  0x10   : > { %v218_v3 = vld [vmem:[%s212_s25] sm:$0xff]  ;;  %s207_s5 = scalar_lea.vmem %s414_s0, %s338_s21 }
  0x11   : > { %v220_v4 = vcombine.high %v218_v3, %v218_v3  ;;  %222 = vst [vmem:[%s217_s28] sm:$0xf] %v218_v3  ;;  %v224_v13 = vld [vmem:[%s207_s5] sm:$0xff] }
  0x13   : > { %223 = vst [vmem:[%s217_s28 + $0x8] sm:$0xf] %v220_v4 }
  0x86   : > { %v229_v11 = vpop.permute.xlu0 %228 }
  0x87   : > { %v236_v12 = vrot.slane %v229_v11, %v235_v10 }
  0x89   : > { %v238_v15 = vmul.f32 %v236_v12, %v224_v13 }
  0x8a   : > { %v243_v14 = vpop.permute.xlu0 %242 }
  0x8b   : > { %v250_v16 = vrot.slane %v243_v14, %v235_v10 }
  0x8d   : > { %v252_v17 = vadd.f32 %v250_v16, %v238_v15 }
  0x8f   : > { %v254_v18 = vcombine.low %v252_v17, %v252_v17  ;;  %257 = vst [vmem:[%s217_s28 + $0x8] sm:$0xf0] %v252_v17 }
  0x91   : > { %256 = vst [vmem:[%s217_s28] sm:$0xf0] %v254_v18 }
  0x92 PF: > { %s14_s15 = sadd.s32 1, %s359_s15  }
  0x93   : > { %p11_p4 = scmp.ge.s32.totalorder %s14_s15, 4  }
  0x95   :  { %13 = sbr.rel (!%p11_p4) target bundleno = 1 (0x1), region = 69 }

</bundles_post_ra>
